<compile_context>
chip_gen: v6e
topology: v6e:2x2x1
jax: 0.10.0
libtpu: 0.0.40
codegen_flags: <defaults>
</compile_context>

<pallas_src>
import functools
import math

import jax
import jax.numpy as jnp
from jax.experimental import pallas as pl
from jax.experimental.pallas import tpu as pltpu

_LANE = 128
_MiB = 1024 * 1024


def _vmem_capacity_bytes():
    try:
        return int(pltpu.get_tpu_info().vmem_capacity_bytes)
    except Exception:
        return 64 * _MiB          # conservative (v7x-sized) fallback


def _is_v5e():
    try:
        kind = jax.devices()[0].device_kind.lower()
        return ("v5 lite" in kind) or ("v5e" in kind) or ("v5litepod" in kind)
    except Exception:
        return False


def _conv_sigmoid(w_ref, g, gpad_ref, C, ks, pad, off):
    """ks-tap 'same' zero-padded 1-D conv over channels + sigmoid.

    g: (1, C, 1) f32 per-channel sums (1/HW already folded into the taps).
    gpad_ref: (1, C + 2*off, 1) f32 scratch; `off` is a multiple of 8 >= pad so
    the data store is sublane-aligned; only the ks finalize loads are shifted.
    Returns att of shape (1, C, 1), f32.
    """
    gpad_ref[...] = jnp.zeros_like(gpad_ref)
    gpad_ref[:, pl.ds(off, C), :] = g
    conv = jnp.zeros((1, C, 1), jnp.float32)
    for k in range(ks):                                 # ks is tiny; static unroll
        conv = conv + w_ref[k] * gpad_ref[:, pl.ds(off + k - pad, C), :]
    return jax.nn.sigmoid(conv)


def _eca_fused_kernel(w_ref, x_ref, o_ref, gpad_ref, *, C, ks, pad, off,
                      compute_dtype):
    """Single pass: GAP reduce -> conv -> sigmoid -> broadcast multiply."""
    x = x_ref[...]                                                   # (1, C, HW)
    g = jnp.sum(x.astype(jnp.float32), axis=-1, keepdims=True)       # (1, C, 1)
    att = _conv_sigmoid(w_ref, g, gpad_ref, C, ks, pad, off)         # (1, C, 1)
    o_ref[...] = (x.astype(compute_dtype) *
                  att.astype(compute_dtype)).astype(o_ref.dtype)


def _eca_att_kernel(w_ref, x_ref, att_ref, gpad_ref, *, C, ks, pad, off,
                    hw, hw_tile, ragged):
    """Fallback pass 1: tiled spatial-sum reduction + conv + sigmoid."""
    t = pl.program_id(1)

    @pl.when(t == 0)
    def _():
        gpad_ref[...] = jnp.zeros_like(gpad_ref)

    xf = x_ref[...].astype(jnp.float32)                 # (1, C, hw_tile)
    if ragged:
        # Mask garbage lanes of the partial last tile before reducing.
        idx = jax.lax.broadcasted_iota(jnp.int32, xf.shape, 2)
        xf = jnp.where(idx < (hw - t * hw_tile), xf, 0.0)
    part = jnp.sum(xf, axis=-1, keepdims=True)           # (1, C, 1)
    gpad_ref[:, pl.ds(off, C), :] += part                # aligned accumulate

    @pl.when(t == pl.num_programs(1) - 1)
    def _():
        g = gpad_ref[:, pl.ds(off, C), :]
        att_ref[...] = _conv_sigmoid(w_ref, g, gpad_ref, C, ks, pad, off)


def _eca_apply_kernel(att_ref, x_ref, o_ref, *, compute_dtype):
    """Fallback pass 2: lane-dense broadcast multiply x * att."""
    a = att_ref[...].astype(compute_dtype)               # (1, C, 1)
    o_ref[...] = (x_ref[...].astype(compute_dtype) * a).astype(o_ref.dtype)


def eca_block(x, w, ks, *, hw_tile=None, force_two_pass=False, in_place=False):
    """ECA forward: y = x * sigmoid(conv1d_k(GAP(x))) for NCHW x."""
    B, C, H, W = x.shape
    pad = ks // 2
    off = ((pad + 7) // 8) * 8 if pad > 0 else 0          # sublane-aligned offset
    hw = H * W
    itemsize = x.dtype.itemsize

    x3 = x.reshape(B, C, hw)
    # Fold the 1/(H*W) of the global average pool into the conv taps (host side).
    w_taps = w.astype(jnp.float32) / float(hw)

    # bf16 multiply on chips with a bf16 VPU (v6e/v7x); f32 elsewhere.
    compute_dtype = (x.dtype if (x.dtype == jnp.bfloat16 and not _is_v5e())
                     else jnp.float32)

    # Generation-aware VMEM budget (v7x: 64 MiB physical, v5e/v6e: 128 MiB).
    vmem_phys = _vmem_capacity_bytes()
    vmem_limit = int(min(96 * _MiB, max(32 * _MiB, vmem_phys * 3 // 4)))

    # Estimated VMEM footprint of the fused path (double-buffered in + out
    # slabs, plus an f32 temp if the multiply upcasts a sub-32-bit input).
    c_r = ((C + 7) // 8) * 8
    hw_r = ((hw + _LANE - 1) // _LANE) * _LANE
    slab_in = c_r * hw_r * itemsize
    slab_f32 = c_r * hw_r * 4
    fused_bytes = 4 * slab_in
    if x.dtype != jnp.float32 and compute_dtype == jnp.float32:
        fused_bytes += slab_f32
    use_fused = (not force_two_pass) and (fused_bytes <= int(vmem_limit * 0.8))

    aliases = {1: 0} if in_place else {}
    gpad_scratch = pltpu.VMEM((1, C + 2 * off, 1), jnp.float32)
    smem_spec = pl.BlockSpec(memory_space=pltpu.MemorySpace.SMEM)

    if use_fused:
        # ---- fused single pass: read x once, write y once ------------------
        x_spec = pl.BlockSpec((1, C, hw), lambda b: (b, 0, 0))
        out3 = pl.pallas_call(
            functools.partial(_eca_fused_kernel, C=C, ks=ks, pad=pad, off=off,
                              compute_dtype=compute_dtype),
            out_shape=jax.ShapeDtypeStruct((B, C, hw), x.dtype),
            grid=(B,),
            in_specs=[smem_spec, x_spec],
            out_specs=x_spec,
            scratch_shapes=[gpad_scratch],
            input_output_aliases=aliases,
            compiler_params=pltpu.CompilerParams(
                dimension_semantics=("parallel",),
                vmem_limit_bytes=vmem_limit),
            cost_estimate=pl.CostEstimate(
                flops=int(B * C * (2 * hw + 2 * ks)),
                transcendentals=int(B * C),
                bytes_accessed=int(2 * B * C * hw * itemsize)),
        )(w_taps, x3)
        return out3.reshape(B, C, H, W)

    # ---- fallback: two tiled passes (oversized per-batch slabs) -------------
    target_slab = 8 * _MiB if vmem_phys >= 100 * _MiB else 4 * _MiB
    if hw_tile is None:
        cap = max(_LANE, (target_slab // max(1, C * itemsize)) // _LANE * _LANE)
        hw_tile = int(min(hw_r, cap))
    if hw_tile % _LANE != 0:
        raise ValueError("hw_tile must be a multiple of 128 (TPU lane width)")
    num_t = (hw + hw_tile - 1) // hw_tile
    ragged = (hw % hw_tile) != 0

    grid = (B, num_t)
    x_spec = pl.BlockSpec((1, C, hw_tile), lambda b, t: (b, 0, t))
    att_spec = pl.BlockSpec((1, C, 1), lambda b, t: (b, 0, 0))

    # pass 1: attention weights in (B, C, 1) layout (no relayout needed later)
    att = pl.pallas_call(
        functools.partial(_eca_att_kernel, C=C, ks=ks, pad=pad, off=off,
                          hw=hw, hw_tile=hw_tile, ragged=ragged),
        out_shape=jax.ShapeDtypeStruct((B, C, 1), jnp.float32),
        grid=grid,
        in_specs=[smem_spec, x_spec],
        out_specs=att_spec,
        scratch_shapes=[gpad_scratch],
        compiler_params=pltpu.CompilerParams(
            dimension_semantics=("parallel", "arbitrary"),
            vmem_limit_bytes=vmem_limit),
        cost_estimate=pl.CostEstimate(
            flops=int(B * C * (hw + 2 * ks)),
            transcendentals=int(B * C),
            bytes_accessed=int(B * C * hw * itemsize + B * C * 4)),
    )(w_taps, x3)

    # pass 2: lane-dense broadcast multiply (masked stores handle ragged tail)
    out3 = pl.pallas_call(
        functools.partial(_eca_apply_kernel, compute_dtype=compute_dtype),
        out_shape=jax.ShapeDtypeStruct((B, C, hw), x.dtype),
        grid=grid,
        in_specs=[att_spec, x_spec],
        out_specs=x_spec,
        input_output_aliases=aliases,
        compiler_params=pltpu.CompilerParams(
            dimension_semantics=("parallel", "parallel"),
            vmem_limit_bytes=vmem_limit),
        cost_estimate=pl.CostEstimate(
            flops=int(B * C * hw),
            transcendentals=0,
            bytes_accessed=int(2 * B * C * hw * itemsize + B * C * 4)),
    )(att, x3)

    return out3.reshape(B, C, H, W)


def eca_reference(x, w, ks):
    """Plain-JAX reference matching the PyTorch forward exactly."""
    B, C, H, W = x.shape
    pad = ks // 2
    gap = jnp.mean(x, axis=(2, 3))                        # (B, C)
    gp = jnp.pad(gap, ((0, 0), (pad, pad)))
    conv = sum(w[k] * gp[:, k:k + C] for k in range(ks))
    att = jax.nn.sigmoid(conv)
    return x * att[:, :, None, None]


if __name__ == "__main__":
    def run_case(B, C, H, W, key):
        gamma, b_ = 2, 1
        t = int(abs(math.log2(C) + b_) / gamma)
        ks = t if t % 2 else t + 1                        # C=16 -> ks=3, pad=1
        kx, kw = jax.random.split(key)
        x = jax.random.normal(kx, (B, C, H, W), dtype=jnp.float32)
        # PyTorch Conv1d default init: U(-sqrt(1/(in_ch*ks)), +sqrt(1/(in_ch*ks)))
        bound = 1.0 / math.sqrt(1 * ks)
        w = jax.random.uniform(kw, (ks,), minval=-bound, maxval=bound,
                               dtype=jnp.float32)
        ref = eca_reference(x, w, ks)

        # Fused single-pass path (default for VMEM-resident slabs).
        out_f = jax.block_until_ready(eca_block(x, w, ks))
        assert out_f.shape == (B, C, H, W)
        assert jnp.allclose(out_f, ref, atol=1e-5, rtol=1e-5), "fused mismatch"

        # Two-pass tiled fallback (exercises init/accumulate/finalize reduction
        # and, when H*W % 128 != 0, the in-kernel ragged-tail masking).
        out_2 = jax.block_until_ready(
            eca_block(x, w, ks, force_two_pass=True, hw_tile=128))
        assert jnp.allclose(out_2, ref, atol=1e-5, rtol=1e-5), "two-pass mismatch"

    key = jax.random.PRNGKey(0)
    k1, k2 = jax.random.split(key)
    run_case(2, 16, 16, 16, k1)   # spatial size divisible by 128
    run_case(2, 16, 12, 12, k2)   # ragged spatial size (144) -> masked tail
    print("KERNEL_OK")
</pallas_src>

<mosaic_0001>
module attributes {stable_mosaic.version = 11 : i64} {
  func.func @_eca_fused_kernel(%arg0: i32, %arg1: memref<3xf32, #tpu.memory_space<smem>>, %arg2: memref<1x16x256xf32, #tpu.memory_space<vmem>>, %arg3: memref<1x16x256xf32, #tpu.memory_space<vmem>>, %arg4: memref<1x32x1xf32, #tpu.memory_space<vmem>>) attributes {dimension_semantics = [#tpu.dimension_semantics<parallel>], iteration_bounds = array<i64: 2>, scalar_prefetch = 0 : i64, scratch_operands = 1 : i64, tpu.core_type = #tpu.core_type<tc>, window_params = [{transform_indices = @transform_0, window_bounds = array<i64: 3>}, {transform_indices = @transform_1, window_bounds = array<i64: 1, 16, 256>}, {transform_indices = @transform_2, window_bounds = array<i64: 1, 16, 256>}]} {
    %c0 = arith.constant 0 : index
    %c0_0 = arith.constant 0 : index
    %c0_1 = arith.constant 0 : index
    %0 = vector.load %arg2[%c0, %c0_0, %c0_1] : memref<1x16x256xf32, #tpu.memory_space<vmem>>, vector<1x16x256xf32>
    %cst = arith.constant dense<0.000000e+00> : vector<1x16xf32>
    %1 = vector.multi_reduction <add>, %0, %cst [2] : vector<1x16x256xf32> to vector<1x16xf32>
    %2 = vector.shape_cast %1 : vector<1x16xf32> to vector<1x16x1xf32>
    %cst_2 = arith.constant 0.000000e+00 : f32
    %3 = vector.broadcast %cst_2 : f32 to vector<1x32x1xf32>
    %c0_3 = arith.constant 0 : index
    %c0_4 = arith.constant 0 : index
    %c0_5 = arith.constant 0 : index
    %4 = vector.load %arg4[%c0_3, %c0_4, %c0_5] : memref<1x32x1xf32, #tpu.memory_space<vmem>>, vector<1x32x1xf32>
    tpu.vector_store %arg4[%c0_3, %c0_4, %c0_5], %3 {strides = array<i32>} : memref<1x32x1xf32, #tpu.memory_space<vmem>>, vector<1x32x1xf32>,
    %c0_6 = arith.constant 0 : index
    %c8 = arith.constant 8 : index
    %c0_7 = arith.constant 0 : index
    %5 = vector.load %arg4[%c0_6, %c8, %c0_7] : memref<1x32x1xf32, #tpu.memory_space<vmem>>, vector<1x16x1xf32>
    tpu.vector_store %arg4[%c0_6, %c8, %c0_7], %2 {strides = array<i32>} : memref<1x32x1xf32, #tpu.memory_space<vmem>>, vector<1x16x1xf32>,
    %cst_8 = arith.constant 0.000000e+00 : f32
    %6 = vector.broadcast %cst_8 : f32 to vector<1x16x1xf32>
    %c0_9 = arith.constant 0 : index
    %7 = memref.load %arg1[%c0_9] : memref<3xf32, #tpu.memory_space<smem>>
    %c0_10 = arith.constant 0 : index
    %c7 = arith.constant 7 : index
    %c0_11 = arith.constant 0 : index
    %8 = vector.load %arg4[%c0_10, %c7, %c0_11] : memref<1x32x1xf32, #tpu.memory_space<vmem>>, vector<1x16x1xf32>
    %9 = vector.broadcast %7 : f32 to vector<1x16x1xf32>
    %10 = arith.mulf %9, %8 : vector<1x16x1xf32>
    %11 = arith.addf %6, %10 : vector<1x16x1xf32>
    %c1 = arith.constant 1 : index
    %12 = memref.load %arg1[%c1] : memref<3xf32, #tpu.memory_space<smem>>
    %c0_12 = arith.constant 0 : index
    %c8_13 = arith.constant 8 : index
    %c0_14 = arith.constant 0 : index
    %13 = vector.load %arg4[%c0_12, %c8_13, %c0_14] : memref<1x32x1xf32, #tpu.memory_space<vmem>>, vector<1x16x1xf32>
    %14 = vector.broadcast %12 : f32 to vector<1x16x1xf32>
    %15 = arith.mulf %14, %13 : vector<1x16x1xf32>
    %16 = arith.addf %11, %15 : vector<1x16x1xf32>
    %c2 = arith.constant 2 : index
    %17 = memref.load %arg1[%c2] : memref<3xf32, #tpu.memory_space<smem>>
    %c0_15 = arith.constant 0 : index
    %c9 = arith.constant 9 : index
    %c0_16 = arith.constant 0 : index
    %18 = vector.load %arg4[%c0_15, %c9, %c0_16] : memref<1x32x1xf32, #tpu.memory_space<vmem>>, vector<1x16x1xf32>
    %19 = vector.broadcast %17 : f32 to vector<1x16x1xf32>
    %20 = arith.mulf %19, %18 : vector<1x16x1xf32>
    %21 = arith.addf %16, %20 : vector<1x16x1xf32>
    %22 = arith.negf %21 : vector<1x16x1xf32>
    %23 = math.exp %22 : vector<1x16x1xf32>
    %cst_17 = arith.constant 1.000000e+00 : f32
    %24 = vector.broadcast %cst_17 : f32 to vector<1x16x1xf32>
    %25 = arith.addf %24, %23 : vector<1x16x1xf32>
    %26 = arith.divf %24, %25 : vector<1x16x1xf32>
    %27 = vector.broadcast %26 : vector<1x16x1xf32> to vector<1x16x256xf32>
    %28 = arith.mulf %0, %27 : vector<1x16x256xf32>
    %c0_18 = arith.constant 0 : index
    %c0_19 = arith.constant 0 : index
    %c0_20 = arith.constant 0 : index
    %29 = vector.load %arg3[%c0_18, %c0_19, %c0_20] : memref<1x16x256xf32, #tpu.memory_space<vmem>>, vector<1x16x256xf32>
    tpu.vector_store %arg3[%c0_18, %c0_19, %c0_20], %28 {strides = array<i32>} : memref<1x16x256xf32, #tpu.memory_space<vmem>>, vector<1x16x256xf32>,
    return
  }
  func.func @transform_0(%arg0: i32) -> i32 {
    %c0_i32 = arith.constant 0 : i32
    %c0_i32_0 = arith.constant 0 : i32
    return %c0_i32 : i32
  }
  func.func @transform_1(%arg0: i32) -> (i32, i32, i32) {
    %c0_i32 = arith.constant 0 : i32
    %c0_i32_0 = arith.constant 0 : i32
    %c0_i32_1 = arith.constant 0 : i32
    return %arg0, %c0_i32, %c0_i32_0 : i32, i32, i32
  }
  func.func @transform_2(%arg0: i32) -> (i32, i32, i32) {
    %c0_i32 = arith.constant 0 : i32
    %c0_i32_0 = arith.constant 0 : i32
    %c0_i32_1 = arith.constant 0 : i32
    return %arg0, %c0_i32, %c0_i32_0 : i32, i32, i32
  }
}

</mosaic_0001>

<bundles_post_ra>
// kernel: tpu_custom_call.1
= control target key start
LH: loop header
LB: loop body
LE: loop exit
PB: predicated region body
PF: predicated region fallthrough
CT: control target
= control target key end

     0   :  { %7 = vsyncpa [#allocation6], 0  ;;  %s763_s0 = inlined_call_operand.hbm [shape: f32[3], index: 0, kind: input, shape index: {}]   ;;  %s764_s1 = inlined_call_operand.hbm [shape: f32[2,16,256], index: 1, kind: input, shape index: {}]   ;;  %s765_s2 = inlined_call_operand.hbm [shape: f32[2,16,256], index: 2, kind: output, shape index: {}]  }
   0x1   :  { %8 = vsyncpa [#allocation4], 0 }
   0x2   :  { %10 = vsyncpa [#allocation4 + $0x1], 0 }
   0x3   :  { %11 = vsyncpa [#allocation5], 0 }
   0x4   :  { %13 = vsyncpa [#allocation5 + $0x1], 0  ;;  %s572_s9 = smov 0   ;;  %s574_s10 = smov 0  }
   0x5   :  { %s576_s11 = smov 0   ;;  %s578_s12 = smov 0  }
   0x6 LB: > { %s593_s13 = sadd.s32 4294967295, %s546_s12   ;;  %s344_s14 = sadd.s32 4294967294, %s546_s12   ;;  %s546_s12 = sphi %s578_s12, %s787_s12   ;;  %s542_s11 = sphi %s576_s11, %s786_s11   ;;  %s538_s10 = sphi %s574_s10, %s785_s10   ;;  %s534_s9 = sphi %s572_s9, %s784_s9  }
   0x7   : > { %s597_s15 = sadd.s32 1, %s546_s12   ;;  %s47_s16 = sadd.s32 1, %s542_s11 }
   0x8   : > { %s44_s17 = ssub.s32 %s546_s12, %s597_s15  ;;  %p54_p0 = scmp.ne.s32.totalorder %s542_s11, %s538_s10 }
   0x9   : > { %p45_p1 = scmp.eq.s32.totalorder %s44_s17, 0  ;;  %p55_p2 = scmp.eq.s32.totalorder %s546_s12, 0 }
   0xa   : > { %p60_p3 = scmp.ne.s32.totalorder %s538_s10, %s534_s9  ;;  %p766_p4 = scmp.eq.s32.totalorder %s593_s13, 0 }
   0xb   : > { %s609_s18 = scalar_select %p45_p1, %s542_s11, %s47_s16  }
   0xc   : > { %p611_p5 = por %p55_p2, %p54_p0  ;;  %p617_p6 = por %p766_p4, %p60_p3 }
   0xd   : > { %p84_p7 = scmp.eq.s32.totalorder %s593_s13, 1  ;;  %p90_p8 = scmp.eq.s32.totalorder %s344_s14, 1 }
   0xe   : > { %s771_s20 = scalar_select %p617_p6, 1, 0 }
   0xf   : > { %p345_p9 = scmp.ge.s32.totalorder %s546_s12, 1  ;;  %p97_p10 = scmp.lt.s32.totalorder %s546_s12, 3 }
  0x10   : > { %p624_p11 = por %p84_p7, %p54_p0  ;;  %p628_p12 = por %p90_p8, %p60_p3 }
  0x11   : > { %p632_p13 = pnand %p345_p9, %p97_p10  ;;  %p387_p4 = scmp.lt.s32.totalorder %s546_s12, 2 }
  0x12   : > { %s772_s21 = scalar_select %p624_p11, 1, 0 }
  0x13   : > { %s773_s22 = scalar_select %p628_p12, 1, 0 }
  0x14   : > { %s774_s23 = scalar_select %p632_p13, 1, 0 }
  0x15   : > { %p374_p2 = pneg %p632_p13  ;;  %s119_s24 = sand.u32 1, %s542_s11  }
  0x16   : > { %s364_s25 = sshll.u32 %s546_s12, 9  ;;  %p775_p6 = scmp.eq.s32.totalorder %s593_s13, 0 }
  0x17   : > { %p646_p7 = pnand %p387_p4, %p611_p5  ;;  %s348_s27 = sshll.u32 %s119_s24, 5 }
  0x18   : > { %p375_p0 = pnand %p374_p2, %p775_p6  ;;  %s548_s28 = smov [#allocation3]  }
  0x19   : > { %s656_s5 = scalar_lea.hbm %s764_s1, %s364_s25  ;;  %s123_s6 = scalar_lea.vmem [#allocation7], %s348_s27 }
  0x1a   : > { %377 = dma.hbm_to_smem (!%p375_p0), %s763_s0, 16, %s548_s28, [#allocation6]  }
  0x1b   : > { %s130_s7 = sshll.u32 %s123_s6, 4  ;;  %s660_s8 = scalar_lea.sflag [#allocation4], %s119_s24  ;;  %s658_s7 = int_to_ptr.vmem [resolvable:$true] %s130_s7 }
  0x1c   : > { %s450_s14 = scalar_lea.hbm %s656_s5, 512  ;;  %p452_p4 = pneg %p646_p7 }
  0x1d   : > { %p451_p3 = scmp.ne.s32.totalorder %s656_s5, %s450_s14  ;;  %s455_s19 = scalar_lea.hbm %s764_s1, 1024 }
  0x1e   : > { %p456_p8 = scmp.lt.s32.totalorder %s656_s5, %s764_s1  ;;  %p457_p9 = scmp.lt.s32.totalorder %s455_s19, %s450_s14 }
  0x1f   : > { %p453_p5 = pnand %p452_p4, %p451_p3 }
  0x20   : > { %p458_p10 = por %p457_p9, %p456_p8 }
  0x21   : > { %p454_p6 = pneg %p453_p5 }
  0x23   : > { %p459_p2 = pnand %p458_p10, %p454_p6 }
  0x25   : > { %462 = shalt.err (!%p459_p2)
}
  0x26   : > { %s463_s24 = scalar_lea.vmem %s658_s7, 512  ;;  %s549_s27 = smov [#allocation7]  }
  0x27   : > { %p464_p0 = scmp.ne.s32.totalorder %s658_s7, %s463_s24  ;;  %s468_s29 = sshll.u32 %s549_s27, 4  ;;  %s469_s29 = int_to_ptr.vmem [resolvable:$false] %s468_s29 }
  0x28   : > { %s470_s30 = scalar_lea.vmem %s469_s29, 1024  ;;  %p471_p5 = scmp.lt.s32.totalorder %s658_s7, %s469_s29 }
  0x29   : > { %p466_p1 = pnand %p464_p0, %p452_p4  ;;  %p472_p12 = scmp.lt.s32.totalorder %s470_s30, %s463_s24 }
  0x2b   : > { %p467_p3 = pneg %p466_p1  ;;  %p473_p11 = por %p472_p12, %p471_p5 }
  0x2d   : > { %p474_p13 = pnand %p473_p11, %p467_p3 }
  0x2f   : > { %477 = shalt.err (!%p474_p13)
}
  0x30   : > { %s550_s3 = smov 256   ;;  %s551_s4 = smov 16  }
  0x31   : > { %381 = dma.hbm_to_vmem [thread:$0]  (!%p646_p7), %s656_s5, 512, %s658_s7, %s660_s8, %s550_s3, %s550_s3, %s551_s4  }
  0x32   : > { %p777_p4 = scmp.ne.s32.totalorder %s774_s23, 0 }
  0x33   : > { %p778_p1 = scmp.eq.s32.totalorder (!%p777_p4), %s593_s13, 0 }
  0x34   : > { %142 = sbr.rel (%p777_p4) target bundleno = 397 (0x18d), region = 28 }
  0x39   : > { %521 = dma.done.wait (%p778_p1), [#allocation6], 16   ;;  %p779_p6 = pmov %p778_p1 }
  0x3a   : > { %s688_s6 = sand.u32 1, %s538_s10   ;;  %p780_p11 = scmp.ne.s32.totalorder %s771_s20, 0 }
  0x3b   : > { %523 = vsyncadd (%p779_p6), [#allocation6], 4294967280  ;;  %s353_s14 = sshll.u32 %s688_s6, 5  ;;  %s149_s16 = scalar_lea.sflag [#allocation4], %s688_s6 }
  0x3c   : > { %s152_s26 = scalar_lea.vmem [#allocation7], %s353_s14 }
  0x3d   : > { %525 = dma.done.wait (%p780_p11), %s149_s16, 512  }
  0x3e   : > { %527 = vsyncadd (%p780_p11), %s149_s16, 4294966784 }
  0x3f   : > { %157 = sfence }
  0x40   : > { %v174_v0 = vld [vmem:[%s152_s26] sm:$0xff]  ;;  %v175_v1 = vld [vmem:[%s152_s26 + $0x8] sm:$0xff]  ;;  %v698_v2 = vld [vmem:[%s152_s26 + $0x10] sm:$0xff]  ;;  %vm184_vm0 = vcmask 7168   ;;  %v552_v5 = vmov 0.0   ;;  %v553_v7 = vmov 0  }
  0x41   : > { %v178_v3 = vadd.f32 %v175_v1, %v174_v0  ;;  %v700_v4 = vld [vmem:[%s152_s26 + $0x18] sm:$0xff]  ;;  %185 = vst.msk [vmem:[#allocation2] sm:$0xff] %vm184_vm0, %v552_v5  ;;  %186 = vst.msk [vmem:[#allocation2 + $0x8] sm:$0xff] %vm184_vm0, %v552_v5  ;;  %429 = vset.pattern.permute.xlu1 %v553_v7  ;;  %430 = vset.pattern.permute.xlu0 %v553_v7  ;;  %s191_s20 = sld [smem:[#allocation3]]  ;;  %s173_s7 = scalar_lea.vmem [#allocation8], %s353_s14 }
  0x42   : > { %188 = vst.msk [vmem:[#allocation2 + $0x18] sm:$0xff] %vm184_vm0, %v552_v5  ;;  %187 = vst.msk [vmem:[#allocation2 + $0x10] sm:$0xff] %vm184_vm0, %v552_v5  ;;  %v181_v6 = vadd.f32 %v700_v4, %v698_v2  ;;  %s355_s23 = sld [smem:[#allocation3 + $0x1]]  ;;  %s259_s8 = sshll.u32 %s173_s7, 4  ;;  %s713_s8 = int_to_ptr.vmem [resolvable:$true] %s259_s8 }
  0x43   : > { %179 = vadd.xlane.f32.xlu0 %v178_v3  ;;  %s356_s5 = sld [smem:[#allocation3 + $0x2]]  ;;  %s365_s17 = sshll.u32 %s593_s13, 9 }
  0x44   : > { %s718_s28 = scalar_lea.hbm %s765_s2, %s365_s17  ;;  %s246_s13 = scalar_lea.sflag [#allocation5], %s688_s6 }
  0x45   : > { %s478_s24 = scalar_lea.vmem %s713_s8, 512  ;;  %p781_p13 = scmp.ne.s32.totalorder %s772_s21, 0 }
  0x46   : > { %p479_p12 = scmp.ne.s32.totalorder %s713_s8, %s478_s24  ;;  %s554_s27 = smov [#allocation8]  }
  0x47   : > { %182 = vadd.xlane.f32.xlu0 %v181_v6  ;;  %v194_v10 = vstv %s191_s20  ;;  %s482_s29 = sshll.u32 %s554_s27, 4  ;;  %s483_s29 = int_to_ptr.vmem [resolvable:$false] %s482_s29 }
  0x48   : > { %v202_v11 = vstv %s355_s23  ;;  %p480_p7 = pnand %p479_p12, %p781_p13  ;;  %s484_s30 = scalar_lea.vmem %s483_s29, 1024 }
  0x49   : > { %v210_v16 = vstv %s356_s5  ;;  %p485_p9 = scmp.lt.s32.totalorder %s713_s8, %s483_s29  ;;  %p486_p10 = scmp.lt.s32.totalorder %s484_s30, %s478_s24 }
  0x4a   : > { %p481_p8 = pneg %p480_p7 }
  0x4b   : > { %p487_p2 = por %p486_p10, %p485_p9 }
  0x4d   : > { %p488_p0 = pnand %p487_p2, %p481_p8 }
  0xcc   : > { %v180_v8 = vpop.xlane.xlu0 %179 }
  0xcd   : > { %189 = vst.msk [vmem:[#allocation2 + $0x8] sm:$0xff] %vm184_vm0, %v180_v8 }
  0xd0   : > { %v183_v9 = vpop.xlane.xlu0 %182 }
  0xd1   : > { %190 = vst.msk [vmem:[#allocation2 + $0x10] sm:$0xff] %vm184_vm0, %v183_v9 }
  0xd4   : > { %v192_v12 = vld [vmem:[#allocation2 + $0x7] sm:$0xff] }
  0xd5   : > { %v200_v13 = vld [vmem:[#allocation2 + $0x8] sm:$0xff]  ;;  %v195_v14 = vmul.f32 %v194_v10, %v192_v12 }
  0xd6   : > { %v203_v15 = vmul.f32 %v202_v11, %v200_v13 }
  0xd8   : > { %v208_v17 = vld [vmem:[#allocation2 + $0x9] sm:$0xff]  ;;  %v205_v19 = vadd.f32 %v203_v15, %v195_v14  ;;  %v209_v20 = vld [vmem:[#allocation2 + $0x11] sm:$0xff] }
  0xd9   : > { %v193_v18 = vld [vmem:[#allocation2 + $0xf] sm:$0xff]  ;;  %v211_v21 = vmul.f32 %v210_v16, %v208_v17  ;;  %v212_v26 = vmul.f32 %v210_v16, %v209_v20 }
  0xda   : > { %v196_v22 = vmul.f32 %v194_v10, %v193_v18  ;;  %v201_v23 = vld [vmem:[#allocation2 + $0x10] sm:$0xff] }
  0xdb   : > { %v204_v24 = vmul.f32 %v202_v11, %v201_v23  ;;  %v213_v25 = vadd.f32 %v211_v21, %v205_v19 }
  0xdd   : > { %v206_v27 = vadd.f32 %v204_v24, %v196_v22  ;;  %v357_v28 = vmul.f32 -1.442695, %v213_v25 }
  0xdf   : > { %v214_v29 = vadd.f32 %v212_v26, %v206_v27  ;;  %431 = vpow2.f32 %v357_v28 }
  0xe1   : > { %v358_v30 = vmul.f32 -1.442695, %v214_v29 }
  0xe3   : > { %433 = vpow2.f32 %v358_v30 }
  0xec   : > { %v432_v31 = vpop.eup %431 }
  0xed   : > { %v221_v32 = vadd.f32 1.0, %v432_v31 }
  0xef   : > { %435 = vrcp.f32 %v221_v32 }
  0xf0   : > { %v434_v33 = vpop.eup %433 }
  0xf1   : > { %v222_v34 = vadd.f32 1.0, %v434_v33 }
  0xf3   : > { %437 = vrcp.f32 %v222_v34 }
  0xfc   : > { %v436_v35 = vpop.eup %435 }
  0xfd   : > { %229 = vperm.xlu1 %429, %v436_v35  }
 0x100   : > { %v438_v36 = vpop.eup %437 }
 0x101   : > { %234 = vperm.xlu1 %429, %v438_v36  }
 0x178   : > { %v230_v37 = vpop.permute.xlu1 %229 }
 0x179   : > { %v237_v38 = vmul.f32 %v230_v37, %v174_v0  ;;  %v238_v39 = vmul.f32 %v230_v37, %v175_v1 }
 0x17b   : > { %241 = vst [vmem:[%s173_s7] sm:$0xff] %v237_v38  ;;  %242 = vst [vmem:[%s173_s7 + $0x8] sm:$0xff] %v238_v39 }
 0x17c   : > { %v235_v40 = vpop.permute.xlu1 %234 }
 0x17d   : > { %v239_v41 = vmul.f32 %v235_v40, %v698_v2  ;;  %v240_v42 = vmul.f32 %v235_v40, %v700_v4 }
 0x17f   : > { %243 = vst [vmem:[%s173_s7 + $0x10] sm:$0xff] %v239_v41  ;;  %244 = vst [vmem:[%s173_s7 + $0x18] sm:$0xff] %v240_v42 }
 0x180   : > { %491 = shalt.err (!%p488_p0)
}
 0x181   : > { %s492_s3 = scalar_lea.hbm %s718_s28, 512  ;;  %s496_s16 = scalar_lea.hbm %s765_s2, 1024 }
 0x182   : > { %p493_p3 = scmp.ne.s32.totalorder %s718_s28, %s492_s3  ;;  %p497_p1 = scmp.lt.s32.totalorder %s718_s28, %s765_s2 }
 0x183   : > { %p498_p6 = scmp.lt.s32.totalorder %s496_s16, %s492_s3 }
 0x184   : > { %p494_p5 = pnand %p493_p3, %p781_p13 }
 0x185   : > { %p499_p11 = por %p498_p6, %p497_p1 }
 0x186   : > { %p495_p4 = pneg %p494_p5 }
 0x188   : > { %p500_p12 = pnand %p499_p11, %p495_p4 }
 0x18a   : > { %503 = shalt.err (!%p500_p12)
}
 0x18b   : > { %s555_s23 = smov 256   ;;  %s556_s5 = smov 16  }
 0x18c   : > { %372 = dma.vmem_to_hbm [thread:$0]  (%p781_p13), %s713_s8, 512, %s718_s28, %s246_s13, %s555_s23, %s555_s23, %s556_s5  }
 0x18d PF: > { %s274_s7 = sand.u32 1, %s534_s9   ;;  %p782_p7 = scmp.ne.s32.totalorder %s773_s22, 0 }
 0x18e   : > { %p783_p8 = scmp.ge.s32.totalorder %s546_s12, 2  ;;  %s275_s17 = scalar_lea.sflag [#allocation5], %s274_s7 }
 0x190   : > { %p383_p9 = pnand %p783_p8, %p782_p7 }
 0x192   : > { %p384_p10 = pneg %p383_p9 }
 0x194   : > { %529 = dma.done.wait (%p384_p10), %s275_s17, 512  }
 0x195   : > { %531 = vsyncadd (%p384_p10), %s275_s17, 4294966784  ;;  %p16_p2 = scmp.ge.s32.totalorder %s597_s15, 4   ;;  %s784_s9 = smov %s538_s10 }
 0x196   : > { %s785_s10 = smov %s542_s11  ;;  %s786_s11 = smov %s609_s18 }
 0x197   : > { %s787_s12 = smov %s597_s15  ;;  %18 = sbr.rel (!%p16_p2) target bundleno = 6 (0x6), region = 78 }
 0x19c   :  { %280 = vsyncpa [#allocation4], 1 }
 0x19d   :  { %282 = vsyncpa [#allocation4 + $0x1], 1 }
 0x19e   :  { %283 = vsyncpa [#allocation5], 1 }
 0x19f   :  { %285 = vsyncpa [#allocation5 + $0x1], 1 }
 0x1a0   :  { %286 = vsyncpa [#allocation6], 1 }
 0x1a1   :  { %288 = vsyncpa [#allocation6 + $0x1], 1 }

</bundles_post_ra>
